<compile_context>
chip_gen: v7x
topology: tpu7x:2x2x1
jax: 0.10.0
libtpu: 0.0.40
codegen_flags: <defaults>
</compile_context>

<pallas_src>
import functools

import jax
import jax.numpy as jnp
import numpy as np
from jax.experimental import pallas as pl
from jax.experimental.pallas import tpu as pltpu

LANE = 128


def _round_up(x, m):
    return (x + m - 1) // m * m


# ----------------------------------------------------------------------------
# Parameters (Conv2d + eval-mode BatchNorm2d folded), PyTorch-style init.
# ----------------------------------------------------------------------------
def make_params(key, num_conv_layers, num_filters, kernel_size):
    """Folded (Conv2d + eval BN) params in HWIO; values bf16-representable."""
    kh, kw = kernel_size
    eps = 1e-5
    params = []
    for i in range(num_conv_layers):
        in_c = int(i * num_filters / num_conv_layers) or 1
        out_c = int((i + 1) * num_filters / num_conv_layers)
        key, k_w, k_b = jax.random.split(key, 3)
        fan_in = in_c * kh * kw
        bound = 1.0 / np.sqrt(fan_in)
        w = jax.random.uniform(k_w, (kh, kw, in_c, out_c), jnp.float32,
                               minval=-bound, maxval=bound)
        b = jax.random.uniform(k_b, (out_c,), jnp.float32,
                               minval=-bound, maxval=bound)
        gamma = jnp.ones((out_c,), jnp.float32)
        beta = jnp.zeros((out_c,), jnp.float32)
        running_mean = jnp.zeros((out_c,), jnp.float32)
        running_var = jnp.ones((out_c,), jnp.float32)
        scale = gamma / jnp.sqrt(running_var + eps)
        # Round to bf16-representable floats so bf16 MXU operands are exact.
        w_fold = (w * scale).astype(jnp.bfloat16).astype(jnp.float32)
        b_fold = ((b - running_mean) * scale + beta
                  ).astype(jnp.bfloat16).astype(jnp.float32)
        params.append((w_fold, b_fold))
    return params


def _layer_cfgs(params, in_hw, stride):
    sh, sw = stride
    h, w = in_hw
    cfgs = []
    for w_fold, _ in params:
        kh, kw, cin, cout = w_fold.shape
        ho = (h - kh) // sh + 1
        wo = (w - kw) // sw + 1
        cfgs.append(dict(kh=kh, kw=kw, sh=sh, sw=sw, cin=cin, cout=cout,
                         h_in=h, w_in=w, ho=ho, wo=wo,
                         in_lanes=w * cin, out_lanes=wo * cout))
        h, w = ho, wo
    return tuple(cfgs)


def pack_params(params, cfgs):
    """One (L*kh + 1, 128, 128) bf16 buffer: banded conv RHS slabs + bias slab.

    Slab l*kh+di is the banded matrix that folds the W-stride and the (kw,cin)
    contraction for kernel row di of layer l, embedded in a 128x128 zero slab
    (lane layout: in lane = w_in*cin + ci, out lane = w_out*cout + co).
    Slab L*kh row l holds layer l's folded-BN bias in the same out-lane layout.
    """
    n_layers = len(params)
    kh = cfgs[0]["kh"]
    wpack = np.zeros((n_layers * kh + 1, LANE, LANE), np.float32)
    for l, ((w_fold, b_fold), cfg) in enumerate(zip(params, cfgs)):
        assert cfg["kh"] == kh, "ConvSubnet uses one kernel_size for all layers"
        assert cfg["in_lanes"] <= LANE and cfg["out_lanes"] <= LANE
        w_np = np.asarray(w_fold, np.float32)
        b_np = np.asarray(b_fold, np.float32)
        cin, cout = cfg["cin"], cfg["cout"]
        wo, kw, sw = cfg["wo"], cfg["kw"], cfg["sw"]
        for di in range(kh):
            for wp in range(wo):
                for dj in range(kw):
                    wi = wp * sw + dj
                    wpack[l * kh + di,
                          wi * cin:(wi + 1) * cin,
                          wp * cout:(wp + 1) * cout] = w_np[di, dj]
        wpack[n_layers * kh, l, :wo * cout] = np.tile(b_np, wo)
    return jnp.asarray(wpack, jnp.bfloat16)


# ----------------------------------------------------------------------------
# Fused kernel: all Conv+BN+ReLU layers for Nb stacked batch elements.
# ----------------------------------------------------------------------------
def _conv_subnet_kernel(x_ref, w_ref, o_ref, full_scr, scr_a, scr_b, *,
                        cfgs, nb):
    """Refs:
      x_ref   : (nb*H0, 128) bf16   batch-stacked, lane-padded input rows
      w_ref   : (L*kh+1, 128, 128) bf16  banded weight slabs + bias slab
      o_ref   : (nb, ho_L, 128) f32      per-element final activation rows
      full_scr, scr_a, scr_b : (rows, 128) f32 VMEM scratch
    """
    n_layers = len(cfgs)
    kh = cfgs[0]["kh"]
    bias_all = w_ref[n_layers * kh]                 # (128,128) bf16, row l = bias_l
    stack_scrs = (scr_a, scr_b)

    for l, cfg in enumerate(cfgs):
        h_in, ho, sh = cfg["h_in"], cfg["ho"], cfg["sh"]
        m1 = nb * h_in - kh + 1                     # rows of stride-1 banded conv

        # Layer input: the batch-stacked activation rows (a ref, so per-di
        # row windows are plain vector loads).
        in_ref = x_ref if l == 0 else stack_scrs[(l - 1) % 2]

        # VALID conv at row-stride 1 over the whole stacked batch:
        # kh banded matmuls on the MXU, bf16 operands, f32 accumulation.
        acc = None
        for di in range(kh):
            lhs = in_ref[pl.ds(di, m1), :].astype(jnp.bfloat16)      # (m1,128)
            d = jnp.dot(lhs, w_ref[l * kh + di],
                        preferred_element_type=jnp.float32)
            acc = d if acc is None else acc + d

        bias = jax.lax.slice(bias_all, (l, 0), (l + 1, LANE)).astype(jnp.float32)
        act = jnp.maximum(acc + bias, 0.0)                           # (m1,128) f32

        # Apply the H-stride and drop cross-element rows: write the stride-1
        # result to scratch, then pick each element's valid rows with a strided
        # ref read and restack them contiguously for the next layer / output.
        full_scr[pl.ds(0, m1), :] = act
        for b in range(nb):
            base = b * h_in
            rows = pl.ds(base, ho, stride=sh) if sh > 1 else pl.ds(base, ho)
            chunk = full_scr[rows, :]                                # (ho,128)
            if l < n_layers - 1:
                stack_scrs[l % 2][pl.ds(b * ho, ho), :] = chunk
            else:
                o_ref[b] = chunk


# ----------------------------------------------------------------------------
# Wrapper.
# ----------------------------------------------------------------------------
def build_conv_subnet(params, in_hw, stride):
    h0, w0 = in_hw
    assert w0 <= LANE
    cfgs = _layer_cfgs(params, in_hw, stride)
    wpack = pack_params(params, cfgs)
    last = cfgs[-1]
    ho_l, wo_l, cout_l = last["ho"], last["wo"], last["cout"]

    def forward(x_nchw):
        n, c, h, w = x_nchw.shape
        assert c == 1 and (h, w) == (h0, w0)

        # v7x has 2 TensorCores: keep 2 parallel grid steps when the batch
        # splits cleanly; otherwise one big step (always legal, and on
        # v5e/v6e the grid is just a sequential loop anyway).
        grid_steps = 1
        if n >= 2 and n % 2 == 0 and ((n // 2) * h0) % 16 == 0:
            grid_steps = 2
        nb = n // grid_steps

        # NCHW (Cin==1) -> batch-stacked (N*H, W) rows (pure reshape), zero-pad
        # lanes to 128, cast to bf16 (MXU operand dtype, halves input DMA).
        x2 = x_nchw.reshape(n * h0, w0).astype(jnp.bfloat16)
        x2 = jnp.pad(x2, ((0, 0), (0, LANE - w0)))

        rows_pad = _round_up(nb * h0, 8)
        kernel = functools.partial(_conv_subnet_kernel, cfgs=cfgs, nb=nb)

        out = pl.pallas_call(
            kernel,
            out_shape=jax.ShapeDtypeStruct((n, ho_l, LANE), jnp.float32),
            grid_spec=pltpu.PrefetchScalarGridSpec(
                num_scalar_prefetch=0,
                grid=(grid_steps,),
                in_specs=[
                    pl.BlockSpec((nb * h0, LANE), lambda b: (b, 0)),
                    pl.BlockSpec(wpack.shape, lambda b: (0, 0, 0)),
                ],
                out_specs=pl.BlockSpec((nb, ho_l, LANE), lambda b: (b, 0, 0)),
                scratch_shapes=[
                    pltpu.VMEM((rows_pad, LANE), jnp.float32),   # stride-1 rows
                    pltpu.VMEM((rows_pad, LANE), jnp.float32),   # restack ping
                    pltpu.VMEM((rows_pad, LANE), jnp.float32),   # restack pong
                ],
            ),
            compiler_params=pltpu.CompilerParams(
                dimension_semantics=("parallel",)),
        )(x2, wpack)

        # Drop lane padding, split the interleaved (wo, cout) lanes, -> NCHW.
        out = out[:, :, :wo_l * cout_l].reshape(n, ho_l, wo_l, cout_l)
        return jnp.transpose(out, (0, 3, 1, 2))

    return jax.jit(forward)


def conv_subnet_reference(x_nchw, params, stride):
    """Pure-JAX reference with the same math as the kernel
    (bf16 conv operands, f32 accumulation, f32 bias + ReLU)."""
    x = jnp.transpose(x_nchw, (0, 2, 3, 1))
    for w_fold, b_fold in params:
        y = jax.lax.conv_general_dilated(
            x.astype(jnp.bfloat16), w_fold.astype(jnp.bfloat16),
            window_strides=stride, padding="VALID",
            dimension_numbers=("NHWC", "HWIO", "NHWC"),
            preferred_element_type=jnp.float32)
        x = jnp.maximum(y + b_fold, 0.0)
    return jnp.transpose(x, (0, 3, 1, 2))


if __name__ == "__main__":
    # ConvSubnet(num_conv_layers=3, num_filters=12, kernel_size=(3,3), stride=(2,1))
    # channel progression 1 -> 4 -> 8 -> 12 (per the __init__ formula).
    num_conv_layers = 3
    num_filters = 12
    kernel_size = (3, 3)
    stride = (2, 1)

    key = jax.random.PRNGKey(0)
    key, k_x = jax.random.split(key)
    # PyTorch-style NCHW input: batch=8, channels=1, H(time)=32, W(sensors)=9.
    # (batch 8 -> 2 grid steps of 4 stacked elements each.)
    x = jax.random.normal(k_x, (8, 1, 32, 9), dtype=jnp.float32)
    x = x.astype(jnp.bfloat16).astype(jnp.float32)   # bf16-representable values

    params = make_params(key, num_conv_layers, num_filters, kernel_size)
    forward = build_conv_subnet(params, in_hw=(32, 9), stride=stride)

    out = jax.block_until_ready(forward(x))
    ref = jax.block_until_ready(conv_subnet_reference(x, params, stride))

    assert out.shape == ref.shape, (out.shape, ref.shape)
    # Both sides multiply identical bf16 operands with f32 accumulation; the
    # tolerance only has to cover summation-order / MXU pass differences.
    np.testing.assert_allclose(np.asarray(out), np.asarray(ref),
                               rtol=1e-2, atol=1e-2)
    print("KERNEL_OK")
</pallas_src>

<mosaic_0001>
module attributes {stable_mosaic.version = 11 : i64} {
  func.func @_conv_subnet_kernel(%arg0: i32, %arg1: memref<128x128xbf16, #tpu.memory_space<vmem>>, %arg2: memref<10x128x128xbf16, #tpu.memory_space<vmem>>, %arg3: memref<4x3x128xf32, #tpu.memory_space<vmem>>, %arg4: memref<128x128xf32, #tpu.memory_space<vmem>>, %arg5: memref<128x128xf32, #tpu.memory_space<vmem>>, %arg6: memref<128x128xf32, #tpu.memory_space<vmem>>) attributes {dimension_semantics = [#tpu.dimension_semantics<parallel>], iteration_bounds = array<i64: 2>, scalar_prefetch = 0 : i64, scratch_operands = 3 : i64, tpu.core_type = #tpu.core_type<tc>, window_params = [{transform_indices = @transform_0, window_bounds = array<i64: 128, 128>}, {pipeline_mode = #tpu.pipeline_mode<synchronous>, transform_indices = @transform_1, window_bounds = array<i64: 10, 128, 128>}, {transform_indices = @transform_2, window_bounds = array<i64: 4, 3, 128>}]} {
    %c9 = arith.constant 9 : index
    %c0 = arith.constant 0 : index
    %c0_0 = arith.constant 0 : index
    %0 = vector.load %arg2[%c9, %c0, %c0_0] : memref<10x128x128xbf16, #tpu.memory_space<vmem>>, vector<1x128x128xbf16>
    %1 = vector.shape_cast %0 : vector<1x128x128xbf16> to vector<128x128xbf16>
    %c0_1 = arith.constant 0 : index
    %c0_2 = arith.constant 0 : index
    %2 = vector.load %arg1[%c0_1, %c0_2] : memref<128x128xbf16, #tpu.memory_space<vmem>>, vector<126x128xbf16>
    %c0_3 = arith.constant 0 : index
    %c0_4 = arith.constant 0 : index
    %c0_5 = arith.constant 0 : index
    %3 = vector.load %arg2[%c0_3, %c0_4, %c0_5] : memref<10x128x128xbf16, #tpu.memory_space<vmem>>, vector<1x128x128xbf16>
    %4 = vector.shape_cast %3 : vector<1x128x128xbf16> to vector<128x128xbf16>
    %cst = arith.constant dense<0.000000e+00> : vector<126x128xf32>
    %5 = tpu.matmul %2, %4, %cst {dimension_numbers = #tpu.dot_dimension_numbers<[1], [0], [0], [1], [0, 0, 1, 1], [], []>} : vector<126x128xbf16>, vector<128x128xbf16>, vector<126x128xf32> -> vector<126x128xf32>
    %c1 = arith.constant 1 : index
    %c0_6 = arith.constant 0 : index
    %6 = vector.load %arg1[%c1, %c0_6] : memref<128x128xbf16, #tpu.memory_space<vmem>>, vector<126x128xbf16>
    %c1_7 = arith.constant 1 : index
    %c0_8 = arith.constant 0 : index
    %c0_9 = arith.constant 0 : index
    %7 = vector.load %arg2[%c1_7, %c0_8, %c0_9] : memref<10x128x128xbf16, #tpu.memory_space<vmem>>, vector<1x128x128xbf16>
    %8 = vector.shape_cast %7 : vector<1x128x128xbf16> to vector<128x128xbf16>
    %cst_10 = arith.constant dense<0.000000e+00> : vector<126x128xf32>
    %9 = tpu.matmul %6, %8, %cst_10 {dimension_numbers = #tpu.dot_dimension_numbers<[1], [0], [0], [1], [0, 0, 1, 1], [], []>} : vector<126x128xbf16>, vector<128x128xbf16>, vector<126x128xf32> -> vector<126x128xf32>
    %10 = arith.addf %5, %9 : vector<126x128xf32>
    %c2 = arith.constant 2 : index
    %c0_11 = arith.constant 0 : index
    %11 = vector.load %arg1[%c2, %c0_11] : memref<128x128xbf16, #tpu.memory_space<vmem>>, vector<126x128xbf16>
    %c2_12 = arith.constant 2 : index
    %c0_13 = arith.constant 0 : index
    %c0_14 = arith.constant 0 : index
    %12 = vector.load %arg2[%c2_12, %c0_13, %c0_14] : memref<10x128x128xbf16, #tpu.memory_space<vmem>>, vector<1x128x128xbf16>
    %13 = vector.shape_cast %12 : vector<1x128x128xbf16> to vector<128x128xbf16>
    %cst_15 = arith.constant dense<0.000000e+00> : vector<126x128xf32>
    %14 = tpu.matmul %11, %13, %cst_15 {dimension_numbers = #tpu.dot_dimension_numbers<[1], [0], [0], [1], [0, 0, 1, 1], [], []>} : vector<126x128xbf16>, vector<128x128xbf16>, vector<126x128xf32> -> vector<126x128xf32>
    %15 = arith.addf %10, %14 : vector<126x128xf32>
    %16 = vector.extract_strided_slice %1 {offsets = [0, 0], sizes = [1, 128], strides = [1, 1]} : vector<128x128xbf16> to vector<1x128xbf16>
    %17 = arith.extf %16 : vector<1x128xbf16> to vector<1x128xf32>
    %18 = vector.broadcast %17 : vector<1x128xf32> to vector<126x128xf32>
    %19 = arith.addf %15, %18 : vector<126x128xf32>
    %cst_16 = arith.constant 0.000000e+00 : f32
    %20 = vector.broadcast %cst_16 : f32 to vector<126x128xf32>
    %21 = arith.maximumf %19, %20 : vector<126x128xf32>
    %c0_17 = arith.constant 0 : index
    %c0_18 = arith.constant 0 : index
    %22 = vector.load %arg4[%c0_17, %c0_18] : memref<128x128xf32, #tpu.memory_space<vmem>>, vector<126x128xf32>
    tpu.vector_store %arg4[%c0_17, %c0_18], %21 {strides = array<i32>} : memref<128x128xf32, #tpu.memory_space<vmem>>, vector<126x128xf32>,
    %c0_19 = arith.constant 0 : index
    %c0_20 = arith.constant 0 : index
    %23 = tpu.strided_load %arg4[%c0_19, %c0_20] {strides = array<i32: 2, 1>} : memref<128x128xf32, #tpu.memory_space<vmem>>, vector<15x128xf32>
    %c0_21 = arith.constant 0 : index
    %c0_22 = arith.constant 0 : index
    %24 = vector.load %arg5[%c0_21, %c0_22] : memref<128x128xf32, #tpu.memory_space<vmem>>, vector<15x128xf32>
    tpu.vector_store %arg5[%c0_21, %c0_22], %23 {strides = array<i32>} : memref<128x128xf32, #tpu.memory_space<vmem>>, vector<15x128xf32>,
    %c32 = arith.constant 32 : index
    %c0_23 = arith.constant 0 : index
    %25 = tpu.strided_load %arg4[%c32, %c0_23] {strides = array<i32: 2, 1>} : memref<128x128xf32, #tpu.memory_space<vmem>>, vector<15x128xf32>
    %c15 = arith.constant 15 : index
    %c0_24 = arith.constant 0 : index
    %26 = vector.load %arg5[%c15, %c0_24] : memref<128x128xf32, #tpu.memory_space<vmem>>, vector<15x128xf32>
    tpu.vector_store %arg5[%c15, %c0_24], %25 {strides = array<i32>} : memref<128x128xf32, #tpu.memory_space<vmem>>, vector<15x128xf32>,
    %c64 = arith.constant 64 : index
    %c0_25 = arith.constant 0 : index
    %27 = tpu.strided_load %arg4[%c64, %c0_25] {strides = array<i32: 2, 1>} : memref<128x128xf32, #tpu.memory_space<vmem>>, vector<15x128xf32>
    %c30 = arith.constant 30 : index
    %c0_26 = arith.constant 0 : index
    %28 = vector.load %arg5[%c30, %c0_26] : memref<128x128xf32, #tpu.memory_space<vmem>>, vector<15x128xf32>
    tpu.vector_store %arg5[%c30, %c0_26], %27 {strides = array<i32>} : memref<128x128xf32, #tpu.memory_space<vmem>>, vector<15x128xf32>,
    %c96 = arith.constant 96 : index
    %c0_27 = arith.constant 0 : index
    %29 = tpu.strided_load %arg4[%c96, %c0_27] {strides = array<i32: 2, 1>} : memref<128x128xf32, #tpu.memory_space<vmem>>, vector<15x128xf32>
    %c45 = arith.constant 45 : index
    %c0_28 = arith.constant 0 : index
    %30 = vector.load %arg5[%c45, %c0_28] : memref<128x128xf32, #tpu.memory_space<vmem>>, vector<15x128xf32>
    tpu.vector_store %arg5[%c45, %c0_28], %29 {strides = array<i32>} : memref<128x128xf32, #tpu.memory_space<vmem>>, vector<15x128xf32>,
    %c0_29 = arith.constant 0 : index
    %c0_30 = arith.constant 0 : index
    %31 = vector.load %arg5[%c0_29, %c0_30] : memref<128x128xf32, #tpu.memory_space<vmem>>, vector<58x128xf32>
    %32 = arith.truncf %31 : vector<58x128xf32> to vector<58x128xbf16>
    %c3 = arith.constant 3 : index
    %c0_31 = arith.constant 0 : index
    %c0_32 = arith.constant 0 : index
    %33 = vector.load %arg2[%c3, %c0_31, %c0_32] : memref<10x128x128xbf16, #tpu.memory_space<vmem>>, vector<1x128x128xbf16>
    %34 = vector.shape_cast %33 : vector<1x128x128xbf16> to vector<128x128xbf16>
    %cst_33 = arith.constant dense<0.000000e+00> : vector<58x128xf32>
    %35 = tpu.matmul %32, %34, %cst_33 {dimension_numbers = #tpu.dot_dimension_numbers<[1], [0], [0], [1], [0, 0, 1, 1], [], []>} : vector<58x128xbf16>, vector<128x128xbf16>, vector<58x128xf32> -> vector<58x128xf32>
    %c1_34 = arith.constant 1 : index
    %c0_35 = arith.constant 0 : index
    %36 = vector.load %arg5[%c1_34, %c0_35] : memref<128x128xf32, #tpu.memory_space<vmem>>, vector<58x128xf32>
    %37 = arith.truncf %36 : vector<58x128xf32> to vector<58x128xbf16>
    %c4 = arith.constant 4 : index
    %c0_36 = arith.constant 0 : index
    %c0_37 = arith.constant 0 : index
    %38 = vector.load %arg2[%c4, %c0_36, %c0_37] : memref<10x128x128xbf16, #tpu.memory_space<vmem>>, vector<1x128x128xbf16>
    %39 = vector.shape_cast %38 : vector<1x128x128xbf16> to vector<128x128xbf16>
    %cst_38 = arith.constant dense<0.000000e+00> : vector<58x128xf32>
    %40 = tpu.matmul %37, %39, %cst_38 {dimension_numbers = #tpu.dot_dimension_numbers<[1], [0], [0], [1], [0, 0, 1, 1], [], []>} : vector<58x128xbf16>, vector<128x128xbf16>, vector<58x128xf32> -> vector<58x128xf32>
    %41 = arith.addf %35, %40 : vector<58x128xf32>
    %c2_39 = arith.constant 2 : index
    %c0_40 = arith.constant 0 : index
    %42 = vector.load %arg5[%c2_39, %c0_40] : memref<128x128xf32, #tpu.memory_space<vmem>>, vector<58x128xf32>
    %43 = arith.truncf %42 : vector<58x128xf32> to vector<58x128xbf16>
    %c5 = arith.constant 5 : index
    %c0_41 = arith.constant 0 : index
    %c0_42 = arith.constant 0 : index
    %44 = vector.load %arg2[%c5, %c0_41, %c0_42] : memref<10x128x128xbf16, #tpu.memory_space<vmem>>, vector<1x128x128xbf16>
    %45 = vector.shape_cast %44 : vector<1x128x128xbf16> to vector<128x128xbf16>
    %cst_43 = arith.constant dense<0.000000e+00> : vector<58x128xf32>
    %46 = tpu.matmul %43, %45, %cst_43 {dimension_numbers = #tpu.dot_dimension_numbers<[1], [0], [0], [1], [0, 0, 1, 1], [], []>} : vector<58x128xbf16>, vector<128x128xbf16>, vector<58x128xf32> -> vector<58x128xf32>
    %47 = arith.addf %41, %46 : vector<58x128xf32>
    %48 = vector.extract_strided_slice %1 {offsets = [1, 0], sizes = [1, 128], strides = [1, 1]} : vector<128x128xbf16> to vector<1x128xbf16>
    %49 = arith.extf %48 : vector<1x128xbf16> to vector<1x128xf32>
    %50 = vector.broadcast %49 : vector<1x128xf32> to vector<58x128xf32>
    %51 = arith.addf %47, %50 : vector<58x128xf32>
    %cst_44 = arith.constant 0.000000e+00 : f32
    %52 = vector.broadcast %cst_44 : f32 to vector<58x128xf32>
    %53 = arith.maximumf %51, %52 : vector<58x128xf32>
    %c0_45 = arith.constant 0 : index
    %c0_46 = arith.constant 0 : index
    %54 = vector.load %arg4[%c0_45, %c0_46] : memref<128x128xf32, #tpu.memory_space<vmem>>, vector<58x128xf32>
    tpu.vector_store %arg4[%c0_45, %c0_46], %53 {strides = array<i32>} : memref<128x128xf32, #tpu.memory_space<vmem>>, vector<58x128xf32>,
    %c0_47 = arith.constant 0 : index
    %c0_48 = arith.constant 0 : index
    %55 = tpu.strided_load %arg4[%c0_47, %c0_48] {strides = array<i32: 2, 1>} : memref<128x128xf32, #tpu.memory_space<vmem>>, vector<7x128xf32>
    %c0_49 = arith.constant 0 : index
    %c0_50 = arith.constant 0 : index
    %56 = vector.load %arg6[%c0_49, %c0_50] : memref<128x128xf32, #tpu.memory_space<vmem>>, vector<7x128xf32>
    tpu.vector_store %arg6[%c0_49, %c0_50], %55 {strides = array<i32>} : memref<128x128xf32, #tpu.memory_space<vmem>>, vector<7x128xf32>,
    %c15_51 = arith.constant 15 : index
    %c0_52 = arith.constant 0 : index
    %57 = tpu.strided_load %arg4[%c15_51, %c0_52] {strides = array<i32: 2, 1>} : memref<128x128xf32, #tpu.memory_space<vmem>>, vector<7x128xf32>
    %c7 = arith.constant 7 : index
    %c0_53 = arith.constant 0 : index
    %58 = vector.load %arg6[%c7, %c0_53] : memref<128x128xf32, #tpu.memory_space<vmem>>, vector<7x128xf32>
    tpu.vector_store %arg6[%c7, %c0_53], %57 {strides = array<i32>} : memref<128x128xf32, #tpu.memory_space<vmem>>, vector<7x128xf32>,
    %c30_54 = arith.constant 30 : index
    %c0_55 = arith.constant 0 : index
    %59 = tpu.strided_load %arg4[%c30_54, %c0_55] {strides = array<i32: 2, 1>} : memref<128x128xf32, #tpu.memory_space<vmem>>, vector<7x128xf32>
    %c14 = arith.constant 14 : index
    %c0_56 = arith.constant 0 : index
    %60 = vector.load %arg6[%c14, %c0_56] : memref<128x128xf32, #tpu.memory_space<vmem>>, vector<7x128xf32>
    tpu.vector_store %arg6[%c14, %c0_56], %59 {strides = array<i32>} : memref<128x128xf32, #tpu.memory_space<vmem>>, vector<7x128xf32>,
    %c45_57 = arith.constant 45 : index
    %c0_58 = arith.constant 0 : index
    %61 = tpu.strided_load %arg4[%c45_57, %c0_58] {strides = array<i32: 2, 1>} : memref<128x128xf32, #tpu.memory_space<vmem>>, vector<7x128xf32>
    %c21 = arith.constant 21 : index
    %c0_59 = arith.constant 0 : index
    %62 = vector.load %arg6[%c21, %c0_59] : memref<128x128xf32, #tpu.memory_space<vmem>>, vector<7x128xf32>
    tpu.vector_store %arg6[%c21, %c0_59], %61 {strides = array<i32>} : memref<128x128xf32, #tpu.memory_space<vmem>>, vector<7x128xf32>,
    %c0_60 = arith.constant 0 : index
    %c0_61 = arith.constant 0 : index
    %63 = vector.load %arg6[%c0_60, %c0_61] : memref<128x128xf32, #tpu.memory_space<vmem>>, vector<26x128xf32>
    %64 = arith.truncf %63 : vector<26x128xf32> to vector<26x128xbf16>
    %c6 = arith.constant 6 : index
    %c0_62 = arith.constant 0 : index
    %c0_63 = arith.constant 0 : index
    %65 = vector.load %arg2[%c6, %c0_62, %c0_63] : memref<10x128x128xbf16, #tpu.memory_space<vmem>>, vector<1x128x128xbf16>
    %66 = vector.shape_cast %65 : vector<1x128x128xbf16> to vector<128x128xbf16>
    %cst_64 = arith.constant dense<0.000000e+00> : vector<26x128xf32>
    %67 = tpu.matmul %64, %66, %cst_64 {dimension_numbers = #tpu.dot_dimension_numbers<[1], [0], [0], [1], [0, 0, 1, 1], [], []>} : vector<26x128xbf16>, vector<128x128xbf16>, vector<26x128xf32> -> vector<26x128xf32>
    %c1_65 = arith.constant 1 : index
    %c0_66 = arith.constant 0 : index
    %68 = vector.load %arg6[%c1_65, %c0_66] : memref<128x128xf32, #tpu.memory_space<vmem>>, vector<26x128xf32>
    %69 = arith.truncf %68 : vector<26x128xf32> to vector<26x128xbf16>
    %c7_67 = arith.constant 7 : index
    %c0_68 = arith.constant 0 : index
    %c0_69 = arith.constant 0 : index
    %70 = vector.load %arg2[%c7_67, %c0_68, %c0_69] : memref<10x128x128xbf16, #tpu.memory_space<vmem>>, vector<1x128x128xbf16>
    %71 = vector.shape_cast %70 : vector<1x128x128xbf16> to vector<128x128xbf16>
    %cst_70 = arith.constant dense<0.000000e+00> : vector<26x128xf32>
    %72 = tpu.matmul %69, %71, %cst_70 {dimension_numbers = #tpu.dot_dimension_numbers<[1], [0], [0], [1], [0, 0, 1, 1], [], []>} : vector<26x128xbf16>, vector<128x128xbf16>, vector<26x128xf32> -> vector<26x128xf32>
    %73 = arith.addf %67, %72 : vector<26x128xf32>
    %c2_71 = arith.constant 2 : index
    %c0_72 = arith.constant 0 : index
    %74 = vector.load %arg6[%c2_71, %c0_72] : memref<128x128xf32, #tpu.memory_space<vmem>>, vector<26x128xf32>
    %75 = arith.truncf %74 : vector<26x128xf32> to vector<26x128xbf16>
    %c8 = arith.constant 8 : index
    %c0_73 = arith.constant 0 : index
    %c0_74 = arith.constant 0 : index
    %76 = vector.load %arg2[%c8, %c0_73, %c0_74] : memref<10x128x128xbf16, #tpu.memory_space<vmem>>, vector<1x128x128xbf16>
    %77 = vector.shape_cast %76 : vector<1x128x128xbf16> to vector<128x128xbf16>
    %cst_75 = arith.constant dense<0.000000e+00> : vector<26x128xf32>
    %78 = tpu.matmul %75, %77, %cst_75 {dimension_numbers = #tpu.dot_dimension_numbers<[1], [0], [0], [1], [0, 0, 1, 1], [], []>} : vector<26x128xbf16>, vector<128x128xbf16>, vector<26x128xf32> -> vector<26x128xf32>
    %79 = arith.addf %73, %78 : vector<26x128xf32>
    %80 = vector.extract_strided_slice %1 {offsets = [2, 0], sizes = [1, 128], strides = [1, 1]} : vector<128x128xbf16> to vector<1x128xbf16>
    %81 = arith.extf %80 : vector<1x128xbf16> to vector<1x128xf32>
    %82 = vector.broadcast %81 : vector<1x128xf32> to vector<26x128xf32>
    %83 = arith.addf %79, %82 : vector<26x128xf32>
    %cst_76 = arith.constant 0.000000e+00 : f32
    %84 = vector.broadcast %cst_76 : f32 to vector<26x128xf32>
    %85 = arith.maximumf %83, %84 : vector<26x128xf32>
    %c0_77 = arith.constant 0 : index
    %c0_78 = arith.constant 0 : index
    %86 = vector.load %arg4[%c0_77, %c0_78] : memref<128x128xf32, #tpu.memory_space<vmem>>, vector<26x128xf32>
    tpu.vector_store %arg4[%c0_77, %c0_78], %85 {strides = array<i32>} : memref<128x128xf32, #tpu.memory_space<vmem>>, vector<26x128xf32>,
    %c0_79 = arith.constant 0 : index
    %c0_80 = arith.constant 0 : index
    %87 = tpu.strided_load %arg4[%c0_79, %c0_80] {strides = array<i32: 2, 1>} : memref<128x128xf32, #tpu.memory_space<vmem>>, vector<3x128xf32>
    %c0_81 = arith.constant 0 : index
    %c0_82 = arith.constant 0 : index
    %c0_83 = arith.constant 0 : index
    %88 = vector.load %arg3[%c0_81, %c0_82, %c0_83] : memref<4x3x128xf32, #tpu.memory_space<vmem>>, vector<1x3x128xf32>
    %89 = vector.shape_cast %88 : vector<1x3x128xf32> to vector<3x128xf32>
    %90 = vector.shape_cast %87 : vector<3x128xf32> to vector<1x3x128xf32>
    tpu.vector_store %arg3[%c0_81, %c0_82, %c0_83], %90 {strides = array<i32>} : memref<4x3x128xf32, #tpu.memory_space<vmem>>, vector<1x3x128xf32>,
    %c7_84 = arith.constant 7 : index
    %c0_85 = arith.constant 0 : index
    %91 = tpu.strided_load %arg4[%c7_84, %c0_85] {strides = array<i32: 2, 1>} : memref<128x128xf32, #tpu.memory_space<vmem>>, vector<3x128xf32>
    %c1_86 = arith.constant 1 : index
    %c0_87 = arith.constant 0 : index
    %c0_88 = arith.constant 0 : index
    %92 = vector.load %arg3[%c1_86, %c0_87, %c0_88] : memref<4x3x128xf32, #tpu.memory_space<vmem>>, vector<1x3x128xf32>
    %93 = vector.shape_cast %92 : vector<1x3x128xf32> to vector<3x128xf32>
    %94 = vector.shape_cast %91 : vector<3x128xf32> to vector<1x3x128xf32>
    tpu.vector_store %arg3[%c1_86, %c0_87, %c0_88], %94 {strides = array<i32>} : memref<4x3x128xf32, #tpu.memory_space<vmem>>, vector<1x3x128xf32>,
    %c14_89 = arith.constant 14 : index
    %c0_90 = arith.constant 0 : index
    %95 = tpu.strided_load %arg4[%c14_89, %c0_90] {strides = array<i32: 2, 1>} : memref<128x128xf32, #tpu.memory_space<vmem>>, vector<3x128xf32>
    %c2_91 = arith.constant 2 : index
    %c0_92 = arith.constant 0 : index
    %c0_93 = arith.constant 0 : index
    %96 = vector.load %arg3[%c2_91, %c0_92, %c0_93] : memref<4x3x128xf32, #tpu.memory_space<vmem>>, vector<1x3x128xf32>
    %97 = vector.shape_cast %96 : vector<1x3x128xf32> to vector<3x128xf32>
    %98 = vector.shape_cast %95 : vector<3x128xf32> to vector<1x3x128xf32>
    tpu.vector_store %arg3[%c2_91, %c0_92, %c0_93], %98 {strides = array<i32>} : memref<4x3x128xf32, #tpu.memory_space<vmem>>, vector<1x3x128xf32>,
    %c21_94 = arith.constant 21 : index
    %c0_95 = arith.constant 0 : index
    %99 = tpu.strided_load %arg4[%c21_94, %c0_95] {strides = array<i32: 2, 1>} : memref<128x128xf32, #tpu.memory_space<vmem>>, vector<3x128xf32>
    %c3_96 = arith.constant 3 : index
    %c0_97 = arith.constant 0 : index
    %c0_98 = arith.constant 0 : index
    %100 = vector.load %arg3[%c3_96, %c0_97, %c0_98] : memref<4x3x128xf32, #tpu.memory_space<vmem>>, vector<1x3x128xf32>
    %101 = vector.shape_cast %100 : vector<1x3x128xf32> to vector<3x128xf32>
    %102 = vector.shape_cast %99 : vector<3x128xf32> to vector<1x3x128xf32>
    tpu.vector_store %arg3[%c3_96, %c0_97, %c0_98], %102 {strides = array<i32>} : memref<4x3x128xf32, #tpu.memory_space<vmem>>, vector<1x3x128xf32>,
    return
  }
  func.func @transform_0(%arg0: i32) -> (i32, i32) {
    %c0_i32 = arith.constant 0 : i32
    %c0_i32_0 = arith.constant 0 : i32
    return %arg0, %c0_i32 : i32, i32
  }
  func.func @transform_1(%arg0: i32) -> (i32, i32, i32) {
    %c0_i32 = arith.constant 0 : i32
    %c0_i32_0 = arith.constant 0 : i32
    %c0_i32_1 = arith.constant 0 : i32
    %c0_i32_2 = arith.constant 0 : i32
    return %c0_i32, %c0_i32_0, %c0_i32_1 : i32, i32, i32
  }
  func.func @transform_2(%arg0: i32) -> (i32, i32, i32) {
    %c0_i32 = arith.constant 0 : i32
    %c0_i32_0 = arith.constant 0 : i32
    %c0_i32_1 = arith.constant 0 : i32
    return %arg0, %c0_i32, %c0_i32_0 : i32, i32, i32
  }
}

</mosaic_0001>

<bundles_post_ra>
// kernel: forward.1
= control target key start
LH: loop header
LB: loop body
LE: loop exit
PB: predicated region body
PF: predicated region fallthrough
CT: control target
= control target key end

     0   :  { %7 = vsyncpa [#allocation6], 0  ;;  %s2502_s9 = smov 0   ;;  %s2698_s0 = inlined_call_operand.vmem [shape: bf16[256,128], index: 0, kind: input, shape index: {}]   ;;  %s2699_s1 = inlined_call_operand.hbm [shape: bf16[10,128,128], index: 1, kind: input, shape index: {}]   ;;  %s2700_s2 = inlined_call_operand.vmem [shape: f32[8,3,128], index: 2, kind: output, shape index: {}]  }
   0x1 LB: > { %s2508_s10 = sadd.s32 4294967295, %s2482_s9   ;;  %p1847_p0 = scmp.ge.s32.totalorder %s2482_s9, 1  ;;  %s2482_s9 = sphi %s2502_s9, %s13_s9  }
   0x2   : > { %p91_p1 = scmp.lt.s32.totalorder %s2482_s9, 3  ;;  %s2484_s11 = smov [#allocation5]  }
   0x3   : > { %s103_s12 = sshll.u32 %s2484_s11, 4  ;;  %p2701_p3 = scmp.eq.s32.totalorder %s2508_s10, 0  ;;  %s104_s12 = int_to_ptr.vmem [resolvable:$true] %s103_s12 }
   0x4   : > { %p2512_p2 = pnand %p1847_p0, %p91_p1  ;;  %s2444_s17 = scalar_lea.hbm %s2699_s1, 10240 }
   0x5   : > { %p2445_p6 = scmp.ne.s32.totalorder %s2699_s1, %s2444_s17  ;;  %p2451_p10 = scmp.lt.u32.totalorder %s2444_s17, %s2699_s1 }
   0x6   : > { %s2703_s13 = scalar_select %p2512_p2, 1, 0 }
   0x7   : > { %p2345_p4 = pneg %p2512_p2 }
   0x9   : > { %p2521_p5 = pnand %p2701_p3, %p2345_p4 }
   0xb   : > { %p2446_p7 = pneg %p2521_p5 }
   0xd   : > { %p2447_p8 = pnand %p2446_p7, %p2445_p6 }
   0xf   : > { %p2448_p9 = pneg %p2447_p8 }
  0x11   : > { %p2453_p11 = pnand %p2451_p10, %p2448_p9 }
  0x13   : > { %2456 = shalt.err (!%p2453_p11)
}
  0x14   : > { %s2457_s22 = scalar_lea.vmem %s104_s12, 10240  ;;  %p2465_p1 = scmp.lt.s32.totalorder %s104_s12, %s104_s12 }
  0x15   : > { %p2458_p12 = scmp.ne.s32.totalorder %s104_s12, %s2457_s22  ;;  %p2466_p4 = scmp.lt.s32.totalorder %s2457_s22, %s2457_s22 }
  0x17   : > { %p2460_p13 = pnand %p2458_p12, %p2446_p7  ;;  %p2467_p3 = por %p2466_p4, %p2465_p1 }
  0x19   : > { %p2461_p0 = pneg %p2460_p13 }
  0x1b   : > { %p2468_p2 = pnand %p2467_p3, %p2461_p0 }
  0x1d   : > { %2471 = shalt.err (!%p2468_p2)
}
  0x1e   : > { %s2485_s23 = smov 64   ;;  %s2486_s24 = smov 4  }
  0x1f   : > { %2348 = dma.hbm_to_vmem [thread:$0]  (!%p2521_p5), %s2699_s1, 10240, %s104_s12, [#allocation6], %s2485_s23, %s2485_s23, %s2486_s24  }
  0x20   : > { %p2705_p6 = scmp.ne.s32.totalorder %s2703_s13, 0 }
  0x21   : > { %p2706_p8 = scmp.eq.s32.totalorder (!%p2705_p6), %s2508_s10, 0 }
  0x22   : > { %128 = sbr.rel (%p2705_p6) target bundleno = 966 (0x3c6), region = 28 }
  0x29   : > { %2477 = dma.done.wait (%p2706_p8), [#allocation6], 10240   ;;  %p2707_p7 = pmov %p2706_p8 }
  0x2a   : > { %s1852_s27 = sshll.u32 %s2508_s10, 4  ;;  %v2362_v0 = vld [vmem:[#allocation5] sm:$0xff]   ;;  %v2363_v1 = vld [vmem:[#allocation5 + $0x8] sm:$0xff]   ;;  %v2364_v2 = vld [vmem:[#allocation5 + $0x10] sm:$0xff]   ;;  %vm255_vm0 = vsmask.f32 7424 }
  0x2b   : > { %2479 = vsyncadd (%p2707_p7), [#allocation6], 4294957056  ;;  %p151_p2 = scmp.lt.s32.totalorder %s1852_s27, 31  ;;  %2089 = vmatprep.subr.bf16.mxu0 %v2362_v0  ;;  %v2365_v3 = vld [vmem:[#allocation5 + $0x18] sm:$0xff]   ;;  %v2370_v4 = vld [vmem:[#allocation5 + $0x40] sm:$0xff]   ;;  %vm649_vm1 = vcmask 1046528  }
  0x2c   : > { %2090 = vmatpush3.bf16.msra.mxu0 %v2362_v0  ;;  %v2366_v7 = vld [vmem:[#allocation5 + $0x20] sm:$0xff]   ;;  %2057 = vmatprep.subr.bf16.mxu1 %v2370_v4  ;;  %v2375_v10 = vld [vmem:[#allocation5 + $0x48] sm:$0xff]   ;;  %v2377_v13 = vld [vmem:[#allocation5 + $0x50] sm:$0xff]   ;;  %s1854_s4 = sshll.u32 %s2508_s10, 2 }
  0x2d   : > { %s2709_s27 = smov (!%p151_p2, %s1852_s27), 31  ;;  %2091 = vmatprep.subr.bf16.mxu0 %v2363_v1  ;;  %2058 = vmatpush3.bf16.msra.mxu1 %v2370_v4  ;;  %v2367_v16 = vld [vmem:[#allocation5 + $0x28] sm:$0xff]   ;;  %v2368_v19 = vld [vmem:[#allocation5 + $0x30] sm:$0xff]   ;;  %v2381_v20 = vld [vmem:[#allocation5 + $0x58] sm:$0xff]   ;;  %p157_p3 = scmp.lt.s32.totalorder %s1854_s4, 7 }
  0x2e   : > { %s1853_s28 = sshll.u32 %s2709_s27, 2  ;;  %2059 = vmatprep.subr.bf16.mxu1 %v2375_v10  ;;  %v2383_v23 = vld [vmem:[#allocation5 + $0x60] sm:$0xff]   ;;  %v2369_v25 = vld [vmem:[#allocation5 + $0x38] sm:$0xff]   ;;  %v2387_v27 = vld [vmem:[#allocation5 + $0x68] sm:$0xff]  }
  0x2f   : > { %s2551_s3 = scalar_lea.vmem %s2698_s0, %s1853_s28  ;;  %v2374_v30 = vld [vmem:[#allocation5 + $0x80] sm:$0xff]   ;;  %v2389_v34 = vld [vmem:[#allocation5 + $0x70] sm:$0xff]   ;;  %v2376_v40 = vld [vmem:[#allocation5 + $0x88] sm:$0xff]   ;;  %s2711_s4 = smov (!%p157_p3, %s1854_s4), 7 }
  0x30   : > { %2092 = vmatpush3.bf16.msra.mxu0 %v2363_v1  ;;  %v165_v5 = vld [vmem:[%s2551_s3] sm:$0xf]  ;;  %v166_v6 = vld [vmem:[%s2551_s3 + $0x4] sm:$0xf]  ;;  %v2556_v9 = vld [vmem:[%s2551_s3 + $0x8] sm:$0xff]   ;;  %s1855_s5 = sshll.u32 %s2711_s4, 2 }
  0x31   : > { %2093 = vmatprep.subr.bf16.mxu0 %v2364_v2  ;;  %v1856_v8 = vcombine.low %v165_v5, %v166_v6  ;;  %v264_v14 = vshll.u32 %v2556_v9, 16  ;;  %2060 = vmatpush3.bf16.msra.mxu1 %v2375_v10  ;;  %v628_v21 = vld [vmem:[%s2551_s3] sm:$0xe]  ;;  %v2565_v24 = vld [vmem:[%s2551_s3 + $0x10] sm:$0xff]   ;;  %v2569_v29 = vld [vmem:[%s2551_s3 + $0x18] sm:$0xff]   ;;  %v268_v32 = vshrl.u32 %v2556_v9, 16  ;;  %s160_s8 = scalar_lea.vmem %s2700_s2, %s1855_s5 }
  0x32   : > { %2061 = vmatprep.subr.bf16.mxu1 %v2377_v13  ;;  %v1881_v26 = vcombine.low %v628_v21, %v166_v6  ;;  %v272_v28 = vshll.u32 %v2565_v24, 16  ;;  %v2572_v31 = vld [vmem:[%s2551_s3 + $0x20] sm:$0xff]   ;;  %v197_v35 = vld [vmem:[%s2551_s3 + $0x3c] sm:$0xf]  ;;  %v280_v37 = vshll.u32 %v2569_v29, 16  ;;  %v2584_v41 = vld [vmem:[%s2551_s3 + $0x28] sm:$0xff]  }
  0x33   : > { %2105 = vmatprep.mubr.bf16.mxu0 %v1856_v8  ;;  %v257_v11 = vshrl.u32 %v1856_v8, 16  ;;  %v259_v12 = vshll.u32 %v1856_v8, 16  ;;  %v2559_v17 = vrot.slane %v264_v14, 1  ;;  %v288_v38 = vshll.u32 %v2572_v31, 16  ;;  %v2581_v39 = vld [vmem:[%s2551_s3 + $0x38] sm:$0xf] }
  0x34   : > { %2094 = vmatpush3.bf16.msra.mxu0 %v2364_v2  ;;  %v2575_v33 = vrot.slane %v1881_v26, 1  ;;  %v274_v36 = vrot.slane %v272_v28, 1  ;;  %v2587_v42 = vcombine.low %v2581_v39, %v197_v35  ;;  %v651_v43 = vrot.slane %v2556_v9, 1  ;;  %v2591_v44 = vld [vmem:[%s2551_s3 + $0x30] sm:$0xff]   ;;  %v2394_v50 = vld [vmem:[#allocation5 + $0x78] sm:$0xff]   ;;  %v2388_v6 = vld [vmem:[#allocation5 + $0xa8] sm:$0xff]  }
  0x35   : > { %2095 = vmatprep.subr.bf16.mxu0 %v2365_v3  ;;  %v261_v15 = vrot.slane %v259_v12, 1  ;;  %2062 = vmatpush3.bf16.msra.mxu1 %v2377_v13  ;;  %v653_v45 = vrot.slane %v2565_v24, 1  ;;  %v276_v46 = vshrl.u32 %v2565_v24, 16  ;;  %v282_v47 = vrot.slane %v280_v37, 1  ;;  %v2380_v54 = vld [vmem:[#allocation5 + $0x90] sm:$0xff]   ;;  %v2382_v0 = vld [vmem:[#allocation5 + $0x98] sm:$0xff]  }
  0x36   : > { %2063 = vmatprep.subr.bf16.mxu1 %v2381_v20  ;;  %v284_v48 = vshrl.u32 %v2569_v29, 16  ;;  %v296_v49 = vshll.u32 %v2584_v41, 16  ;;  %v290_v51 = vrot.slane %v288_v38, 1  ;;  %v655_v52 = vrot.slane %v2569_v29, 1  ;;  %v180_v8 = vld [vmem:[%s2551_s3 + $0x3c] sm:$0x7] }
  0x37   : > { %v262_v18 = vor.u32 %v261_v15, %v257_v11  ;;  %v304_v53 = vshll.u32 %v2591_v44, 16  ;;  %v292_v55 = vshrl.u32 %v2572_v31, 16  ;;  %v300_v57 = vshrl.u32 %v2584_v41, 16  ;;  %v2393_v11 = vld [vmem:[#allocation5 + $0xb0] sm:$0xff]   ;;  %v2395_v15 = vld [vmem:[#allocation5 + $0xb8] sm:$0xff]   ;;  %v2401_v35 = vld [vmem:[#allocation5 + $0x128] sm:$0xff]  }
  0x38   : > { %2096 = vmatpush3.bf16.msra.mxu0 %v2365_v3  ;;  %v298_v56 = vrot.slane %v296_v49, 1  ;;  %v312_v58 = vshll.u32 %v2587_v42, 16  ;;  %v308_v60 = vshrl.u32 %v2591_v44, 16  ;;  %v316_v62 = vshrl.u32 %v2587_v42, 16  ;;  %v2386_v3 = vld [vmem:[#allocation5 + $0xa0] sm:$0xff]   ;;  %v2403_v37 = vld [vmem:[#allocation5 + $0x138] sm:$0xff]  }
  0x39   : > { %2097 = vmatprep.subr.bf16.mxu0 %v2366_v7  ;;  %v267_v22 = vsel %vm255_vm0, %v262_v18, %v2559_v17  ;;  %2064 = vmatpush3.bf16.msra.mxu1 %v2381_v20  ;;  %v306_v59 = vrot.slane %v304_v53, 1  ;;  %v270_v63 = vor.u32 %v268_v32, %v2559_v17  ;;  %v278_v1 = vor.u32 %v276_v46, %v274_v36  ;;  %v2398_v32 = vld [vmem:[#allocation5 + $0x110] sm:$0xff]   ;;  %v2643_v38 = vld [vmem:[#allocation5 + $0xc0] sm:$0xff]  }
  0x3a   : > { %2073 = vmatprep.mubr.bf16.mxu1 %v267_v22  ;;  %2065 = vmatprep.subr.bf16.mxu1 %v2383_v23  ;;  %v314_v61 = vrot.slane %v312_v58, 1  ;;  %v286_v5 = vor.u32 %v284_v48, %v282_v47  ;;  %v302_v13 = vor.u32 %v300_v57, %v298_v56  ;;  %v1872_v14 = vcombine.low %v2581_v39, %v180_v8  ;;  %v164_v49 = vld [vmem:[#allocation5 + $0x240] sm:$0xf] }
  0x3b   : > { %v275_v2 = vsel %vm255_vm0, %v270_v63, %v274_v36  ;;  %v283_v4 = vsel %vm255_vm0, %v278_v1, %v282_v47  ;;  %v652_v17 = vsel %vm649_vm1, %v2575_v33, %v651_v43  ;;  %v654_v20 = vsel %vm649_vm1, %v651_v43, %v653_v45  ;;  %v2399_v33 = vld [vmem:[#allocation5 + $0x118] sm:$0xff]   ;;  %v2402_v36 = vld [vmem:[#allocation5 + $0x130] sm:$0xff]  }
  0x3c   : > { %2098 = vmatpush3.bf16.msra.mxu0 %v2366_v7  ;;  %v294_v7 = vor.u32 %v292_v55, %v290_v51  ;;  %v291_v10 = vsel %vm255_vm0, %v286_v5, %v290_v51  ;;  %v307_v18 = vsel %vm255_vm0, %v302_v13, %v306_v59  ;;  %v656_v21 = vsel %vm649_vm1, %v653_v45, %v655_v52 }
  0x3d   : > { %2099 = vmatprep.subr.bf16.mxu0 %v2367_v16  ;;  %2066 = vmatpush3.bf16.msra.mxu1 %v2383_v23  ;;  %v318_v22 = vor.u32 %v316_v62, %v314_v61  ;;  %v657_v23 = vrot.slane %v2572_v31, 1  ;;  %v2648_v51 = vunpack.c.l.bf16 %v164_v49 }
  0x3e   : > { %2067 = vmatprep.subr.bf16.mxu1 %v2387_v27  ;;  %v299_v12 = vsel %vm255_vm0, %v294_v7, %v298_v56 }
  0x40   : > { %2100 = vmatpush3.bf16.msra.mxu0 %v2367_v16  ;;  %v310_v16 = vor.u32 %v308_v60, %v306_v59 }
  0x41   : > { %2101 = vmatprep.subr.bf16.mxu0 %v2368_v19  ;;  %2068 = vmatpush3.bf16.msra.mxu1 %v2387_v27  ;;  %v663_v27 = vrot.slane %v2587_v42, 1 }
  0x42   : > { %2069 = vmatprep.subr.bf16.mxu1 %v2389_v34 }
  0x44   : > { %2102 = vmatpush3.bf16.msra.mxu0 %v2368_v19  ;;  %v315_v19 = vsel %vm255_vm0, %v310_v16, %v314_v61 }
  0x45   : > { %2103 = vmatprep.subr.bf16.mxu0 %v2369_v25  ;;  %2070 = vmatpush3.bf16.msra.mxu1 %v2389_v34  ;;  %v2400_v34 = vld [vmem:[#allocation5 + $0x120] sm:$0xff]  }
  0x46   : > { %2071 = vmatprep.subr.bf16.mxu1 %v2394_v50 }
  0x48   : > { %2104 = vmatpush3.bf16.msra.mxu0 %v2369_v25  ;;  %v659_v25 = vrot.slane %v2584_v41, 1 }
  0x49   : > { %2121 = vmatprep.subr.bf16.mxu0 %v2374_v30  ;;  %2072 = vmatpush3.bf16.msra.mxu1 %v2394_v50 }
  0x4a   : > { %v660_v26 = vsel %vm649_vm1, %v657_v23, %v659_v25 }
  0x4b   : > { %2106 = vmatmul.mubr.bf16.vlgmr.msra.gmra.mrb[0].mxu0 %v2556_v9  ;;  %v658_v9 = vsel %vm649_vm1, %v655_v52, %v657_v23 }
  0x4c   : > { %2122 = vmatpush3.bf16.msra.mxu0 %v2374_v30  ;;  %2109 = vmatprep.mubr.bf16.mxu0 %v2565_v24  ;;  %v661_v24 = vrot.slane %v2591_v44, 1 }
  0x4d   : > { %2123 = vmatprep.subr.bf16.mxu0 %v2376_v40  ;;  %2074 = vmatmul.mubr.bf16.vlgmr.msra.gmra.mrb[0].mxu1 %v275_v2 }
  0x4e   : > { %2077 = vmatprep.mubr.bf16.mxu1 %v283_v4  ;;  %v662_v28 = vsel %vm649_vm1, %v659_v25, %v661_v24  ;;  %v664_v30 = vsel %vm649_vm1, %v661_v24, %v663_v27 }
  0x50   : > { %2124 = vmatpush3.bf16.msra.mxu0 %v2376_v40 }
  0x51   : > { %2125 = vmatprep.subr.bf16.mxu0 %v2380_v54 }
  0x53   : > { %2110 = vmatmul.mubr.bf16.gmra.mrb[4].mxu0 %v2569_v29  ;;  %v2397_v29 = vld [vmem:[#allocation5 + $0x108] sm:$0xff]  }
  0x54   : > { %2126 = vmatpush3.bf16.msra.mxu0 %v2380_v54  ;;  %2113 = vmatprep.mubr.bf16.mxu0 %v2572_v31  ;;  %v2396_v31 = vld [vmem:[#allocation5 + $0x100] sm:$0xff]  }
  0x55   : > { %2127 = vmatprep.subr.bf16.mxu0 %v2382_v0  ;;  %2078 = vmatmul.mubr.bf16.gmra.mrb[4].mxu1 %v291_v10 }
  0x56   : > { %2081 = vmatprep.mubr.bf16.mxu1 %v299_v12  ;;  %2153 = vmatprep.subr.bf16.mxu1 %v2396_v31 }
  0x57   : > { %2154 = vmatpush3.bf16.msra.mxu1 %v2396_v31 }
  0x58   : > { %2128 = vmatpush3.bf16.msra.mxu0 %v2382_v0  ;;  %2155 = vmatprep.subr.bf16.mxu1 %v2397_v29 }
  0x59   : > { %2129 = vmatprep.subr.bf16.mxu0 %v2386_v3 }
  0x5b   : > { %2114 = vmatmul.mubr.bf16.gmra.mrb[8].mxu0 %v2584_v41  ;;  %2156 = vmatpush3.bf16.msra.mxu1 %v2397_v29 }
  0x5c   : > { %2130 = vmatpush3.bf16.msra.mxu0 %v2386_v3  ;;  %2117 = vmatprep.mubr.bf16.mxu0 %v2591_v44  ;;  %v835_v44 = vlaneseq }
  0x5d   : > { %2131 = vmatprep.subr.bf16.mxu0 %v2388_v6  ;;  %2082 = vmatmul.mubr.bf16.gmra.mrb[8].mxu1 %v307_v18 }
  0x5e   : > { %2085 = vmatprep.mubr.bf16.mxu1 %v315_v19  ;;  %2157 = vmatprep.subr.bf16.mxu1 %v2398_v32  ;;  %v2646_v48 = vshrl.u32 %v835_v44, 7 }
  0x5f   : > { %2158 = vmatpush3.bf16.msra.mxu1 %v2398_v32 }
  0x60   : > { %2132 = vmatpush3.bf16.msra.mxu0 %v2388_v6  ;;  %2159 = vmatprep.subr.bf16.mxu1 %v2399_v33  ;;  %v837_v52 = vsub.s32 0, %v2646_v48 }
  0x61   : > { %2133 = vmatprep.subr.bf16.mxu0 %v2393_v11 }
  0x62   : > { %v2652_v56 = vrot.slane %v2648_v51, %v837_v52 }
  0x63   : > { %2118 = vmatmul.mubr.bf16.gmra.mrb[12].mxu0 %v1872_v14  ;;  %2160 = vmatpush3.bf16.msra.mxu1 %v2399_v33 }
  0x64   : > { %2134 = vmatpush3.bf16.msra.mxu0 %v2393_v11  ;;  %2137 = vmatprep.mubr.bf16.mxu0 %v652_v17 }
  0x65   : > { %2135 = vmatprep.subr.bf16.mxu0 %v2395_v15  ;;  %2086 = vmatmul.mubr.bf16.gmra.mrb[12].mxu1 %v318_v22 }
  0x66   : > { %2161 = vmatprep.subr.bf16.mxu1 %v2400_v34 }
  0x67   : > { %2162 = vmatpush3.bf16.msra.mxu1 %v2400_v34 }
  0x68   : > { %2136 = vmatpush3.bf16.msra.mxu0 %v2395_v15  ;;  %2163 = vmatprep.subr.bf16.mxu1 %v2401_v35 }
  0x6b   : > { %2138 = vmatmul.mubr.bf16.vlgmr.msra.gmra.mrb[0].mxu0 %v654_v20  ;;  %2164 = vmatpush3.bf16.msra.mxu1 %v2401_v35 }
  0x6c   : > { %2141 = vmatprep.mubr.bf16.mxu0 %v656_v21  ;;  %2165 = vmatprep.subr.bf16.mxu1 %v2402_v36 }
  0x6f   : > { %2166 = vmatpush3.bf16.msra.mxu1 %v2402_v36 }
  0x70   : > { %2167 = vmatprep.subr.bf16.mxu1 %v2403_v37 }
  0x73   : > { %2142 = vmatmul.mubr.bf16.gmra.mrb[4].mxu0 %v658_v9  ;;  %2168 = vmatpush3.bf16.msra.mxu1 %v2403_v37 }
  0x74   : > { %2145 = vmatprep.mubr.bf16.mxu0 %v660_v26  ;;  %2177 = vmatprep.subr.bf16.mxu1 %v2643_v38 }
  0x7b   : > { %2146 = vmatmul.mubr.bf16.gmra.mrb[8].mxu0 %v662_v28 }
  0x7c   : > { %2149 = vmatprep.mubr.bf16.mxu0 %v664_v30 }
  0x83   : > { %2150 = vmatmul.mubr.bf16.gmra.mrb[12].mxu0 %v663_v27 }
 0x120   : > { %v2075_v39 = vpop.f32.mrb[0].mxu1 }
 0x121   : > { %v409_v40 = vpop.f32.mrb[1].mxu1 }
 0x122   : > { %v2076_v41 = vpop.f32.mrb[2].mxu1 }
 0x123   : > { %v412_v42 = vpop.f32.mrb[3].mxu1 }
 0x128   : > { %v2079_v43 = vpop.f32.mrb[4].mxu1 }
 0x129   : > { %v425_v45 = vpop.f32.mrb[5].mxu1 }
 0x12a   : > { %v2080_v46 = vpop.f32.mrb[6].mxu1 }
 0x12b   : > { %v428_v47 = vpop.f32.mrb[7].mxu1 }
 0x130   : > { %v2083_v50 = vpop.f32.mrb[8].mxu1 }
 0x131   : > { %v441_v53 = vpop.f32.mrb[9].mxu1 }
 0x132   : > { %v2084_v54 = vpop.f32.mrb[10].mxu1 }
 0x133   : > { %v444_v55 = vpop.f32.mrb[11].mxu1 }
 0x138   : > { %v2654_v62 = vpop.f32.mrb[12].mxu1 }
 0x139   : > { %v2657_v2 = vpop.f32.mrb[13].mxu1 }
 0x13a   : > { %v2660_v5 = vpop.f32.mrb[14].mxu1 }
 0x13b   : > { %v2663_v8 = vpop.f32.mrb[15].mxu1 }
 0x13e   : > { %v2139_v57 = vpop.f32.mrb[0].mxu0 }
 0x13f   : > { %v2285_v58 = vadd.f32 %v2139_v57, %v2075_v39  ;;  %v755_v59 = vpop.f32.mrb[1].mxu0 }
 0x140   : > { %v2286_v60 = vadd.f32 %v755_v59, %v409_v40  ;;  %v2140_v61 = vpop.f32.mrb[2].mxu0 }
 0x141   : > { %v841_v63 = vadd.f32 %v2285_v58, %v2652_v56  ;;  %v2287_v0 = vadd.f32 %v2140_v61, %v2076_v41  ;;  %v758_v1 = vpop.f32.mrb[3].mxu0 }
 0x142   : > { %v839_v3 = vadd.f32 %v2286_v60, %v2652_v56  ;;  %v2288_v4 = vadd.f32 %v758_v1, %v412_v42 }
 0x143   : > { %v857_v6 = vmax.f32 %v841_v63, 0.0  ;;  %v842_v7 = vadd.f32 %v2287_v0, %v2652_v56 }
 0x144   : > { %v855_v10 = vmax.f32 %v839_v3, 0.0  ;;  %v840_v11 = vadd.f32 %v2288_v4, %v2652_v56 }
 0x145   : > { %873 = vst [vmem:[#allocation2 + $0x10] sm:$0xff] %v857_v6  ;;  %v858_v12 = vmax.f32 %v842_v7, 0.0 }
 0x146   : > { %871 = vst [vmem:[#allocation2] sm:$0xff] %v855_v10  ;;  %v856_v13 = vmax.f32 %v840_v11, 0.0  ;;  %v2143_v14 = vpop.f32.mrb[4].mxu0 }
 0x147   : > { %874 = vst [vmem:[#allocation2 + $0x18] sm:$0xff] %v858_v12  ;;  %v2289_v15 = vadd.f32 %v2143_v14, %v2079_v43  ;;  %v771_v16 = vpop.f32.mrb[5].mxu0 }
 0x148   : > { %872 = vst [vmem:[#allocation2 + $0x8] sm:$0xff] %v856_v13  ;;  %v2290_v17 = vadd.f32 %v771_v16, %v425_v45  ;;  %v2144_v18 = vpop.f32.mrb[6].mxu0  ;;  %v2406_v16 = vld [vmem:[#allocation5 + $0xd0] sm:$0xff]  }
 0x149   : > { %v845_v19 = vadd.f32 %v2289_v15, %v2652_v56  ;;  %v2291_v20 = vadd.f32 %v2144_v18, %v2080_v46  ;;  %v774_v21 = vpop.f32.mrb[7].mxu0  ;;  %v2405_v15 = vld [vmem:[#allocation5 + $0xc8] sm:$0xff]  }
 0x14a   : > { %v843_v22 = vadd.f32 %v2290_v17, %v2652_v56  ;;  %v2292_v23 = vadd.f32 %v774_v21, %v428_v47 }
 0x14b   : > { %v861_v25 = vmax.f32 %v845_v19, 0.0  ;;  %v846_v9 = vadd.f32 %v2291_v20, %v2652_v56 }
 0x14c   : > { %v859_v26 = vmax.f32 %v843_v22, 0.0  ;;  %v844_v24 = vadd.f32 %v2292_v23, %v2652_v56 }
 0x14d   : > { %877 = vst [vmem:[#allocation2 + $0x30] sm:$0xff] %v861_v25  ;;  %v862_v27 = vmax.f32 %v846_v9, 0.0  ;;  %v2407_v25 = vld [vmem:[#allocation5 + $0xd8] sm:$0xff]  }
 0x14e   : > { %v889_v28 = vld [vmem:[#allocation2 + $0x10] ss:$2 sm:$0x7f]  ;;  %875 = vst [vmem:[#allocation2 + $0x20] sm:$0xff] %v859_v26  ;;  %v860_v30 = vmax.f32 %v844_v24, 0.0  ;;  %v2147_v31 = vpop.f32.mrb[8].mxu0 }
 0x14f   : > { %891 = vst [vmem:[#allocation3 + $0x8] sm:$0x7f] %v889_v28  ;;  %v2670_v29 = vld [vmem:[#allocation2] ss:$2 sm:$0xff]  ;;  %878 = vst [vmem:[#allocation2 + $0x38] sm:$0xff] %v862_v27  ;;  %v2293_v32 = vadd.f32 %v2147_v31, %v2083_v50  ;;  %v787_v33 = vpop.f32.mrb[9].mxu0 }
 0x150   : > { %890 = vst [vmem:[#allocation3] sm:$0xff] %v2670_v29  ;;  %876 = vst [vmem:[#allocation2 + $0x28] sm:$0xff] %v860_v30  ;;  %v2294_v34 = vadd.f32 %v787_v33, %v441_v53  ;;  %v2148_v35 = vpop.f32.mrb[10].mxu0  ;;  %v2408_v26 = vld [vmem:[#allocation5 + $0xe0] sm:$0xff]   ;;  %v2410_v24 = vld [vmem:[#allocation5 + $0xf0] sm:$0xff]  }
 0x151   : > { %v849_v36 = vadd.f32 %v2293_v32, %v2652_v56  ;;  %v2295_v37 = vadd.f32 %v2148_v35, %v2084_v54  ;;  %v790_v39 = vpop.f32.mrb[11].mxu0  ;;  %v2411_v27 = vld [vmem:[#allocation5 + $0xf8] sm:$0xff]   ;;  %v2412_v28 = vld [vmem:[#allocation5 + $0x140] sm:$0xff]  }
 0x152   : > { %v847_v40 = vadd.f32 %v2294_v34, %v2652_v56  ;;  %v2296_v41 = vadd.f32 %v790_v39, %v444_v55  ;;  %v2413_v34 = vld [vmem:[#allocation5 + $0x148] sm:$0xff]  }
 0x153   : > { %v865_v42 = vmax.f32 %v849_v36, 0.0  ;;  %v850_v43 = vadd.f32 %v2295_v37, %v2652_v56  ;;  %v2414_v36 = vld [vmem:[#allocation5 + $0x150] sm:$0xff]  }
 0x154   : > { %v863_v44 = vmax.f32 %v847_v40, 0.0  ;;  %v848_v45 = vadd.f32 %v2296_v41, %v2652_v56 }
 0x155   : > { %881 = vst [vmem:[#allocation2 + $0x50] sm:$0xff] %v865_v42  ;;  %v866_v46 = vmax.f32 %v850_v43, 0.0  ;;  %v2415_v43 = vld [vmem:[#allocation5 + $0x158] sm:$0xff]  }
 0x156   : > { %v895_v47 = vld [vmem:[#allocation2 + $0x30] ss:$2 sm:$0x7f]  ;;  %879 = vst [vmem:[#allocation2 + $0x40] sm:$0xff] %v863_v44  ;;  %v864_v49 = vmax.f32 %v848_v45, 0.0  ;;  %v2151_v50 = vpop.f32.mrb[12].mxu0 }
 0x157   : > { %897 = vst [vmem:[#allocation3 + $0x17] sm:$0x7f] %v895_v47  ;;  %v893_v52 = vld [vmem:[#allocation2 + $0x20] ss:$2 sm:$0xff]  ;;  %882 = vst [vmem:[#allocation2 + $0x58] sm:$0xff] %v866_v46  ;;  %v2297_v53 = vadd.f32 %v2151_v50, %v2654_v62  ;;  %v803_v54 = vpop.f32.mrb[13].mxu0 }
 0x158   : > { %896 = vst [vmem:[#allocation3 + $0xf] sm:$0xff] %v893_v52  ;;  %880 = vst [vmem:[#allocation2 + $0x48] sm:$0xff] %v864_v49  ;;  %v2298_v55 = vadd.f32 %v803_v54, %v2657_v2  ;;  %v2152_v57 = vpop.f32.mrb[14].mxu0  ;;  %v1194_v42 = vld [vmem:[#allocation3 + $0x2] sm:$0xff]  ;;  %v2418_v47 = vld [vmem:[#allocation5 + $0x170] sm:$0xff]  }
 0x159   : > { %v853_v58 = vadd.f32 %v2297_v53, %v2652_v56  ;;  %v2299_v59 = vadd.f32 %v2152_v57, %v2660_v5  ;;  %v806_v60 = vpop.f32.mrb[15].mxu0  ;;  %v939_v5 = vld [vmem:[#allocation3 + $0x1] sm:$0xff]  ;;  %v2419_v49 = vld [vmem:[#allocation5 + $0x178] sm:$0xff]  }
 0x15a   : > { %v851_v61 = vadd.f32 %v2298_v55, %v2652_v56  ;;  %v2300_v63 = vadd.f32 %v806_v60, %v2663_v8  ;;  %v2416_v45 = vld [vmem:[#allocation5 + $0x160] sm:$0xff]   ;;  %v2417_v46 = vld [vmem:[#allocation5 + $0x168] sm:$0xff]  }
 0x15b   : > { %v869_v0 = vmax.f32 %v853_v58, 0.0  ;;  %v854_v1 = vadd.f32 %v2299_v59, %v2652_v56 }
 0x15c   : > { %v867_v3 = vmax.f32 %v851_v61, 0.0  ;;  %v852_v62 = vadd.f32 %v2300_v63, %v2652_v56  ;;  %v2420_v61 = vld [vmem:[#allocation5 + $0x1c0] sm:$0xff]   ;;  %v2421_v63 = vld [vmem:[#allocation5 + $0x1c8] sm:$0xff]  }
 0x15d   : > { %885 = vst [vmem:[#allocation2 + $0x70] sm:$0xff] %v869_v0  ;;  %v870_v4 = vmax.f32 %v854_v1, 0.0  ;;  %2225 = vmatprep.subr.bf16.mxu0 %v2420_v61  ;;  %v2422_v0 = vld [vmem:[#allocation5 + $0x1d0] sm:$0xff]   ;;  %v2423_v1 = vld [vmem:[#allocation5 + $0x1d8] sm:$0xff]  }
 0x15e   : > { %v901_v6 = vld [vmem:[#allocation2 + $0x50] ss:$2 sm:$0x7f]  ;;  %883 = vst [vmem:[#allocation2 + $0x60] sm:$0xff] %v867_v3  ;;  %v868_v2 = vmax.f32 %v852_v62, 0.0  ;;  %2226 = vmatpush3.bf16.msra.mxu0 %v2420_v61  ;;  %v2424_v3 = vld [vmem:[#allocation5 + $0x1e0] sm:$0xff]  }
 0x15f   : > { %903 = vst [vmem:[#allocation3 + $0x26] sm:$0x7f] %v901_v6  ;;  %v899_v7 = vld [vmem:[#allocation2 + $0x40] ss:$2 sm:$0xff]  ;;  %886 = vst [vmem:[#allocation2 + $0x78] sm:$0x3f] %v870_v4  ;;  %2227 = vmatprep.subr.bf16.mxu0 %v2421_v63 }
 0x160   : > { %v940_v10 = vld [vmem:[#allocation3 + $0x9] sm:$0xff]  ;;  %902 = vst [vmem:[#allocation3 + $0x1e] sm:$0xff] %v899_v7  ;;  %884 = vst [vmem:[#allocation2 + $0x68] sm:$0xff] %v868_v2  ;;  %v941_v13 = vld [vmem:[#allocation3 + $0x11] sm:$0xff]  ;;  %v1346_v7 = vsub.s32 1, %v2646_v48 }
 0x161   : > { %v947_v11 = vpack.c.bf16 %v940_v10, %v939_v5  ;;  %v911_v23 = vld [vmem:[#allocation3 + $0x8] sm:$0xff]  ;;  %v1196_v53 = vld [vmem:[#allocation3 + $0x12] sm:$0xff]  ;;  %v2428_v2 = vld [vmem:[#allocation5 + $0x180] sm:$0xff]  }
 0x162   : > { %v918_v9 = vpack.c.bf16 %v911_v23, %v2670_v29  ;;  %v912_v29 = vld [vmem:[#allocation3 + $0x10] sm:$0xff]  ;;  %2228 = vmatpush3.bf16.msra.mxu0 %v2421_v63  ;;  %v2425_v62 = vld [vmem:[#allocation5 + $0x1e8] sm:$0xff]   ;;  %v2427_v6 = vld [vmem:[#allocation5 + $0x1f8] sm:$0xff]   ;;  %v1347_v5 = vrot.slane %v2648_v51, %v1346_v7 }
 0x163   : > { %2169 = vmatprep.mubr.bf16.mxu1 %v947_v11  ;;  %v1195_v40 = vld [vmem:[#allocation3 + $0xa] sm:$0xff]  ;;  %2229 = vmatprep.subr.bf16.mxu0 %v2422_v0 }
 0x164   : > { %v1202_v44 = vpack.c.bf16 %v1195_v40, %v1194_v42  ;;  %v2426_v4 = vld [vmem:[#allocation5 + $0x1f0] sm:$0xff]  }
 0x165   : > { %v2438_v63 = vld [vmem:[#allocation5 + $0x210] sm:$0xff]  }
 0x166   : > { %v907_v8 = vld [vmem:[#allocation2 + $0x70] ss:$2 sm:$0x7f]  ;;  %2230 = vmatpush3.bf16.msra.mxu0 %v2422_v0 }
 0x167   : > { %909 = vst [vmem:[#allocation3 + $0x35] sm:$0x7f] %v907_v8  ;;  %v905_v12 = vld [vmem:[#allocation2 + $0x60] ss:$2 sm:$0xff]  ;;  %v913_v30 = vld [vmem:[#allocation3 + $0x18] sm:$0xff]  ;;  %2231 = vmatprep.subr.bf16.mxu0 %v2423_v1 }
 0x168   : > { %v942_v14 = vld [vmem:[#allocation3 + $0x19] sm:$0xff]  ;;  %908 = vst [vmem:[#allocation3 + $0x2d] sm:$0xff] %v905_v12  ;;  %v943_v18 = vld [vmem:[#allocation3 + $0x21] sm:$0xff]  ;;  %v919_v32 = vpack.c.bf16 %v913_v30, %v912_v29 }
 0x169   : > { %v948_v56 = vpack.c.bf16 %v942_v14, %v941_v13  ;;  %v914_v33 = vld [vmem:[#allocation3 + $0x20] sm:$0xff]  ;;  %v2439_v0 = vld [vmem:[#allocation5 + $0x218] sm:$0xff]  }
 0x16a   : > { %v1197_v50 = vld [vmem:[#allocation3 + $0x1a] sm:$0xff]  ;;  %v1198_v55 = vld [vmem:[#allocation3 + $0x22] sm:$0xff]  ;;  %2232 = vmatpush3.bf16.msra.mxu0 %v2423_v1 }
 0x16b   : > { %2170 = vmatmul.mubr.bf16.vlgmr.msra.gmra.mrb[16].mxu1 %v948_v56  ;;  %v1203_v54 = vpack.c.bf16 %v1197_v50, %v1196_v53  ;;  %2233 = vmatprep.subr.bf16.mxu0 %v2424_v3  ;;  %v2434_v50 = vld [vmem:[#allocation5 + $0x1b0] sm:$0xff]   ;;  %v2436_v53 = vld [vmem:[#allocation5 + $0x200] sm:$0xff]  }
 0x16c   : > { %2178 = vmatpush3.bf16.msra.mxu1 %v2643_v38  ;;  %v2409_v38 = vld [vmem:[#allocation5 + $0xe8] sm:$0xff]   ;;  %v2440_v1 = vld [vmem:[#allocation5 + $0x220] sm:$0xff]  }
 0x16d   : > { %2179 = vmatprep.subr.bf16.mxu1 %v2405_v15 }
 0x16e   : > { %v946_v17 = vld [vmem:[#allocation3 + $0x39] sm:$0x3]  ;;  %2234 = vmatpush3.bf16.msra.mxu0 %v2424_v3  ;;  %v2441_v3 = vld [vmem:[#allocation5 + $0x228] sm:$0xff]  }
 0x16f   : > { %v944_v19 = vld [vmem:[#allocation3 + $0x29] sm:$0xff]  ;;  %v945_v20 = vld [vmem:[#allocation3 + $0x31] sm:$0xff]  ;;  %v1201_v59 = vld [vmem:[#allocation3 + $0x3a] sm:$0x3]  ;;  %2235 = vmatprep.subr.bf16.mxu0 %v2425_v62 }
 0x170   : > { %2180 = vmatpush3.bf16.msra.mxu1 %v2405_v15  ;;  %v949_v21 = vpack.c.bf16 %v944_v19, %v943_v18  ;;  %v950_v22 = vpack.c.bf16 %v946_v17, %v945_v20  ;;  %v915_v31 = vld [vmem:[#allocation3 + $0x28] sm:$0xff]  ;;  %v916_v37 = vld [vmem:[#allocation3 + $0x30] sm:$0xff]  ;;  %v917_v39 = vld [vmem:[#allocation3 + $0x38] sm:$0x3] }
 0x171   : > { %2181 = vmatprep.subr.bf16.mxu1 %v2406_v16  ;;  %v920_v35 = vpack.c.bf16 %v915_v31, %v914_v33  ;;  %v921_v41 = vpack.c.bf16 %v917_v39, %v916_v37  ;;  %v1199_v52 = vld [vmem:[#allocation3 + $0x2a] sm:$0xff]  ;;  %v1200_v58 = vld [vmem:[#allocation3 + $0x32] sm:$0xff] }
 0x172   : > { %2173 = vmatprep.mubr.bf16.mxu1 %v949_v21  ;;  %v1204_v57 = vpack.c.bf16 %v1199_v52, %v1198_v55  ;;  %v1205_v60 = vpack.c.bf16 %v1201_v59, %v1200_v58  ;;  %2236 = vmatpush3.bf16.msra.mxu0 %v2425_v62  ;;  %v2435_v52 = vld [vmem:[#allocation5 + $0x1b8] sm:$0xff]   ;;  %v2442_v62 = vld [vmem:[#allocation5 + $0x230] sm:$0xff]  }
 0x173   : > { %2174 = vmatmul.mubr.bf16.gmra.mrb[20].mxu1 %v950_v22  ;;  %2237 = vmatprep.subr.bf16.mxu0 %v2426_v4 }
 0x174   : > { %2182 = vmatpush3.bf16.msra.mxu1 %v2406_v16  ;;  %2193 = vmatprep.mubr.bf16.mxu1 %v918_v9 }
 0x175   : > { %2183 = vmatprep.subr.bf16.mxu1 %v2407_v25 }
 0x176   : > { %2238 = vmatpush3.bf16.msra.mxu0 %v2426_v4  ;;  %v2443_v4 = vld [vmem:[#allocation5 + $0x238] sm:$0xff]  }
 0x177   : > { %2239 = vmatprep.subr.bf16.mxu0 %v2427_v6 }
 0x178   : > { %2184 = vmatpush3.bf16.msra.mxu1 %v2407_v25 }
 0x179   : > { %2185 = vmatprep.subr.bf16.mxu1 %v2408_v26 }
 0x17a   : > { %2240 = vmatpush3.bf16.msra.mxu0 %v2427_v6 }
 0x17b   : > { %2245 = vmatprep.subr.bf16.mxu0 %v2428_v2 }
 0x17c   : > { %2186 = vmatpush3.bf16.msra.mxu1 %v2408_v26 }
 0x17d   : > { %2187 = vmatprep.subr.bf16.mxu1 %v2409_v38 }
 0x180   : > { %2188 = vmatpush3.bf16.msra.mxu1 %v2409_v38 }
 0x181   : > { %2189 = vmatprep.subr.bf16.mxu1 %v2410_v24 }
 0x184   : > { %2190 = vmatpush3.bf16.msra.mxu1 %v2410_v24 }
 0x185   : > { %2191 = vmatprep.subr.bf16.mxu1 %v2411_v27 }
 0x188   : > { %2192 = vmatpush3.bf16.msra.mxu1 %v2411_v27 }
 0x189   : > { %2201 = vmatprep.subr.bf16.mxu1 %v2412_v28 }
 0x18b   : > { %2194 = vmatmul.mubr.bf16.vlgmr.msra.gmra.mrb[16].mxu1 %v919_v32 }
 0x18c   : > { %2197 = vmatprep.mubr.bf16.mxu1 %v920_v35  ;;  %2202 = vmatpush3.bf16.msra.mxu1 %v2412_v28 }
 0x18d   : > { %2203 = vmatprep.subr.bf16.mxu1 %v2413_v34 }
 0x190   : > { %2204 = vmatpush3.bf16.msra.mxu1 %v2413_v34 }
 0x191   : > { %2205 = vmatprep.subr.bf16.mxu1 %v2414_v36 }
 0x193   : > { %2198 = vmatmul.mubr.bf16.gmra.mrb[20].mxu1 %v921_v41 }
 0x194   : > { %2206 = vmatpush3.bf16.msra.mxu1 %v2414_v36  ;;  %2217 = vmatprep.mubr.bf16.mxu1 %v1202_v44 }
 0x195   : > { %2207 = vmatprep.subr.bf16.mxu1 %v2415_v43 }
 0x198   : > { %2208 = vmatpush3.bf16.msra.mxu1 %v2415_v43  ;;  %v2429_v43 = vld [vmem:[#allocation5 + $0x188] sm:$0xff]  }
 0x199   : > { %2209 = vmatprep.subr.bf16.mxu1 %v2416_v45 }
 0x19c   : > { %2210 = vmatpush3.bf16.msra.mxu1 %v2416_v45  ;;  %v2430_v45 = vld [vmem:[#allocation5 + $0x190] sm:$0xff]  }
 0x19d   : > { %2211 = vmatprep.subr.bf16.mxu1 %v2417_v46 }
 0x1a0   : > { %2212 = vmatpush3.bf16.msra.mxu1 %v2417_v46  ;;  %v2431_v46 = vld [vmem:[#allocation5 + $0x198] sm:$0xff]  }
 0x1a1   : > { %2213 = vmatprep.subr.bf16.mxu1 %v2418_v47 }
 0x1a4   : > { %2214 = vmatpush3.bf16.msra.mxu1 %v2418_v47  ;;  %v2432_v47 = vld [vmem:[#allocation5 + $0x1a0] sm:$0xff]  }
 0x1a5   : > { %2215 = vmatprep.subr.bf16.mxu1 %v2419_v49 }
 0x1a8   : > { %2216 = vmatpush3.bf16.msra.mxu1 %v2419_v49  ;;  %v2433_v49 = vld [vmem:[#allocation5 + $0x1a8] sm:$0xff]  }
 0x1ab   : > { %2218 = vmatmul.mubr.bf16.vlgmr.msra.gmra.mrb[16].mxu1 %v1203_v54 }
 0x1ac   : > { %2221 = vmatprep.mubr.bf16.mxu1 %v1204_v57 }
 0x1b3   : > { %2222 = vmatmul.mubr.bf16.gmra.mrb[20].mxu1 %v1205_v60  ;;  %v2437_v60 = vld [vmem:[#allocation5 + $0x208] sm:$0xff]  }
 0x27e   : > { %v2219_v10 = vpop.f32.mrb[16].mxu1 }
 0x27f   : > { %v1350_v11 = vadd.f32 %v2219_v10, %v1347_v5  ;;  %v1305_v8 = vpop.f32.mrb[17].mxu1 }
 0x280   : > { %v1348_v12 = vadd.f32 %v1347_v5, %v1305_v8  ;;  %v2220_v13 = vpop.f32.mrb[18].mxu1 }
 0x281   : > { %v1358_v14 = vmax.f32 %v1350_v11, 0.0  ;;  %v1351_v56 = vadd.f32 %v2220_v13, %v1347_v5  ;;  %v1308_v15 = vpop.f32.mrb[19].mxu1 }
 0x282   : > { %v1356_v16 = vmax.f32 %v1348_v12, 0.0  ;;  %v1349_v17 = vadd.f32 %v1347_v5, %v1308_v15 }
 0x283   : > { %1366 = vst [vmem:[#allocation2 + $0x10] sm:$0xff] %v1358_v14  ;;  %v1359_v18 = vmax.f32 %v1351_v56, 0.0 }
 0x284   : > { %1364 = vst [vmem:[#allocation2] sm:$0xff] %v1356_v16  ;;  %v1357_v19 = vmax.f32 %v1349_v17, 0.0 }
 0x285   : > { %1367 = vst [vmem:[#allocation2 + $0x18] sm:$0xff] %v1359_v18 }
 0x286   : > { %1365 = vst [vmem:[#allocation2 + $0x8] sm:$0xff] %v1357_v19  ;;  %v2223_v20 = vpop.f32.mrb[20].mxu1 }
 0x287   : > { %v1354_v21 = vadd.f32 %v2223_v20, %v1347_v5  ;;  %v1321_v22 = vpop.f32.mrb[21].mxu1 }
 0x288   : > { %v1352_v23 = vadd.f32 %v1347_v5, %v1321_v22  ;;  %v2224_v25 = vpop.f32.mrb[22].mxu1 }
 0x289   : > { %v1362_v9 = vmax.f32 %v1354_v21, 0.0  ;;  %v1355_v26 = vadd.f32 %v2224_v25, %v1347_v5  ;;  %v1324_v38 = vpop.f32.mrb[23].mxu1 }
 0x28a   : > { %v1360_v24 = vmax.f32 %v1352_v23, 0.0  ;;  %v1353_v27 = vadd.f32 %v1347_v5, %v1324_v38  ;;  %v1749_v5 = vsub.s32 2, %v2646_v48 }
 0x28b   : > { %1370 = vst [vmem:[#allocation2 + $0x30] sm:$0xff] %v1362_v9  ;;  %v1363_v28 = vmax.f32 %v1355_v26, 0.0 }
 0x28c   : > { %1368 = vst [vmem:[#allocation2 + $0x20] sm:$0xff] %v1360_v24  ;;  %v1361_v30 = vmax.f32 %v1353_v27, 0.0  ;;  %v1750_v10 = vrot.slane %v2648_v51, %v1749_v5 }
 0x28d   : > { %1371 = vst [vmem:[#allocation2 + $0x38] sm:$0x3] %v1363_v28  ;;  %v1372_v31 = vld [vmem:[#allocation2] ss:$2 sm:$0x7f] }
 0x28e   : > { %v1375_v29 = vld [vmem:[#allocation2 + $0xf] ss:$2 sm:$0x7f]  ;;  %1369 = vst [vmem:[#allocation2 + $0x28] sm:$0xff] %v1361_v30  ;;  %1373 = vst [vmem:[#allocation4] sm:$0x7f] %v1372_v31 }
 0x28f   : > { %1376 = vst [vmem:[#allocation4 + $0x7] sm:$0x7f] %v1375_v29 }
 0x295   : > { %v1381_v32 = vld [vmem:[#allocation2 + $0x2d] ss:$2 sm:$0x7f]  ;;  %v1378_v33 = vld [vmem:[#allocation2 + $0x1e] ss:$2 sm:$0x7f] }
 0x296   : > { %1382 = vst [vmem:[#allocation4 + $0x15] sm:$0x7f] %v1381_v32  ;;  %1379 = vst [vmem:[#allocation4 + $0xe] sm:$0x7f] %v1378_v33  ;;  %v1406_v34 = vld [vmem:[#allocation4 + $0x1] sm:$0xff] }
 0x297   : > { %v1383_v42 = vld [vmem:[#allocation4] sm:$0xff] }
 0x298   : > { %v1623_v59 = vld [vmem:[#allocation4 + $0x2] sm:$0xff] }
 0x29d   : > { %v1407_v35 = vld [vmem:[#allocation4 + $0x9] sm:$0xff]  ;;  %v1408_v36 = vld [vmem:[#allocation4 + $0x11] sm:$0xff]  ;;  %v1409_v37 = vld [vmem:[#allocation4 + $0x19] sm:$0x3] }
 0x29e   : > { %v1410_v39 = vpack.c.bf16 %v1407_v35, %v1406_v34  ;;  %v1411_v40 = vpack.c.bf16 %v1409_v37, %v1408_v36  ;;  %v1384_v41 = vld [vmem:[#allocation4 + $0x8] sm:$0xff]  ;;  %v1385_v54 = vld [vmem:[#allocation4 + $0x10] sm:$0xff]  ;;  %v1386_v55 = vld [vmem:[#allocation4 + $0x18] sm:$0x3] }
 0x29f   : > { %v1387_v44 = vpack.c.bf16 %v1384_v41, %v1383_v42  ;;  %v1624_v57 = vld [vmem:[#allocation4 + $0xa] sm:$0xff]  ;;  %v1388_v58 = vpack.c.bf16 %v1386_v55, %v1385_v54  ;;  %v1625_v6 = vld [vmem:[#allocation4 + $0x12] sm:$0xff] }
 0x2a0   : > { %2241 = vmatprep.mubr.bf16.mxu0 %v1410_v39  ;;  %v1627_v61 = vpack.c.bf16 %v1624_v57, %v1623_v59 }
 0x2a1   : > { %2242 = vmatmul.mubr.bf16.vlgmr.msra.gmra.mrb[16].mxu0 %v1411_v40 }
 0x2a2   : > { %2246 = vmatpush3.bf16.msra.mxu0 %v2428_v2  ;;  %2261 = vmatprep.mubr.bf16.mxu0 %v1387_v44  ;;  %v1626_v2 = vld [vmem:[#allocation4 + $0x1a] sm:$0x3] }
 0x2a3   : > { %2247 = vmatprep.subr.bf16.mxu0 %v2429_v43  ;;  %v1628_v7 = vpack.c.bf16 %v1626_v2, %v1625_v6 }
 0x2a6   : > { %2248 = vmatpush3.bf16.msra.mxu0 %v2429_v43 }
 0x2a7   : > { %2249 = vmatprep.subr.bf16.mxu0 %v2430_v45 }
 0x2aa   : > { %2250 = vmatpush3.bf16.msra.mxu0 %v2430_v45 }
 0x2ab   : > { %2251 = vmatprep.subr.bf16.mxu0 %v2431_v46 }
 0x2ae   : > { %2252 = vmatpush3.bf16.msra.mxu0 %v2431_v46 }
 0x2af   : > { %2253 = vmatprep.subr.bf16.mxu0 %v2432_v47 }
 0x2b2   : > { %2254 = vmatpush3.bf16.msra.mxu0 %v2432_v47 }
 0x2b3   : > { %2255 = vmatprep.subr.bf16.mxu0 %v2433_v49 }
 0x2b6   : > { %2256 = vmatpush3.bf16.msra.mxu0 %v2433_v49 }
 0x2b7   : > { %2257 = vmatprep.subr.bf16.mxu0 %v2434_v50 }
 0x2ba   : > { %2258 = vmatpush3.bf16.msra.mxu0 %v2434_v50 }
 0x2bb   : > { %2259 = vmatprep.subr.bf16.mxu0 %v2435_v52 }
 0x2be   : > { %2260 = vmatpush3.bf16.msra.mxu0 %v2435_v52 }
 0x2bf   : > { %2265 = vmatprep.subr.bf16.mxu0 %v2436_v53 }
 0x2c1   : > { %2262 = vmatmul.mubr.bf16.vlgmr.msra.gmra.mrb[16].mxu0 %v1388_v58 }
 0x2c2   : > { %2266 = vmatpush3.bf16.msra.mxu0 %v2436_v53  ;;  %2281 = vmatprep.mubr.bf16.mxu0 %v1627_v61 }
 0x2c3   : > { %2267 = vmatprep.subr.bf16.mxu0 %v2437_v60 }
 0x2c6   : > { %2268 = vmatpush3.bf16.msra.mxu0 %v2437_v60 }
 0x2c7   : > { %2269 = vmatprep.subr.bf16.mxu0 %v2438_v63 }
 0x2ca   : > { %2270 = vmatpush3.bf16.msra.mxu0 %v2438_v63 }
 0x2cb   : > { %2271 = vmatprep.subr.bf16.mxu0 %v2439_v0 }
 0x2ce   : > { %2272 = vmatpush3.bf16.msra.mxu0 %v2439_v0 }
 0x2cf   : > { %2273 = vmatprep.subr.bf16.mxu0 %v2440_v1 }
 0x2d2   : > { %2274 = vmatpush3.bf16.msra.mxu0 %v2440_v1 }
 0x2d3   : > { %2275 = vmatprep.subr.bf16.mxu0 %v2441_v3 }
 0x2d6   : > { %2276 = vmatpush3.bf16.msra.mxu0 %v2441_v3 }
 0x2d7   : > { %2277 = vmatprep.subr.bf16.mxu0 %v2442_v62 }
 0x2da   : > { %2278 = vmatpush3.bf16.msra.mxu0 %v2442_v62 }
 0x2db   : > { %2279 = vmatprep.subr.bf16.mxu0 %v2443_v4 }
 0x2de   : > { %2280 = vmatpush3.bf16.msra.mxu0 %v2443_v4 }
 0x2e1   : > { %2282 = vmatmul.mubr.bf16.vlgmr.msra.gmra.mrb[16].mxu0 %v1628_v7 }
 0x3b4   : > { %v2283_v11 = vpop.f32.mrb[16].mxu0 }
 0x3b5   : > { %v1753_v8 = vadd.f32 %v2283_v11, %v1750_v10  ;;  %v1728_v12 = vpop.f32.mrb[17].mxu0 }
 0x3b6   : > { %v1751_v13 = vadd.f32 %v1750_v10, %v1728_v12  ;;  %v2284_v14 = vpop.f32.mrb[18].mxu0 }
 0x3b7   : > { %v1757_v56 = vmax.f32 %v1753_v8, 0.0  ;;  %v1754_v15 = vadd.f32 %v2284_v14, %v1750_v10  ;;  %v1731_v16 = vpop.f32.mrb[19].mxu0 }
 0x3b8   : > { %v1755_v17 = vmax.f32 %v1751_v13, 0.0  ;;  %v1752_v18 = vadd.f32 %v1750_v10, %v1731_v16 }
 0x3b9   : > { %1761 = vst [vmem:[#allocation2 + $0x10] sm:$0xff] %v1757_v56  ;;  %v1758_v19 = vmax.f32 %v1754_v15, 0.0 }
 0x3ba   : > { %1759 = vst [vmem:[#allocation2] sm:$0xff] %v1755_v17  ;;  %v1756_v20 = vmax.f32 %v1752_v18, 0.0 }
 0x3bb   : > { %1762 = vst [vmem:[#allocation2 + $0x18] sm:$0x3] %v1758_v19 }
 0x3bc   : > { %1760 = vst [vmem:[#allocation2 + $0x8] sm:$0xff] %v1756_v20 }
 0x3c1   : > { %v1763_v48 = vld [vmem:[#allocation2] ss:$2 sm:$0x7] }
 0x3c2   : > { %1764 = vst [vmem:[%s160_s8] sm:$0x7] %v1763_v48  ;;  %v1774_v22 = vld [vmem:[#allocation2 + $0x15] ss:$2 sm:$0x7] }
 0x3c3   : > { %v1766_v51 = vld [vmem:[#allocation2 + $0x7] ss:$2 sm:$0x7]  ;;  %v1770_v21 = vld [vmem:[#allocation2 + $0xe] ss:$2 sm:$0x7] }
 0x3c4   : > { %1938 = vst [vmem:[%s160_s8 + $0x4] sm:$0x7] %v1766_v51  ;;  %1939 = vst [vmem:[%s160_s8 + $0x8] sm:$0x7] %v1770_v21 }
 0x3c5   : > { %1940 = vst [vmem:[%s160_s8 + $0xc] sm:$0x7] %v1774_v22 }
 0x3c6 PF: > { %s13_s9 = sadd.s32 1, %s2482_s9  }
 0x3c7   : > { %p10_p5 = scmp.ge.s32.totalorder %s13_s9, 4  }
 0x3c9   :  { %12 = sbr.rel (!%p10_p5) target bundleno = 1 (0x1), region = 88 }
 0x3d0   :  { %1799 = vsyncpa [#allocation6], 1 }
 0x3d1   :  { %1801 = vsyncpa [#allocation6 + $0x1], 1 }

</bundles_post_ra>
